<compile_context>
chip_gen: v7x
topology: tpu7x:2x2x1
jax: 0.10.0
libtpu: 0.0.40
codegen_flags: <defaults>
</compile_context>

<pallas_src>
import jax
import jax.numpy as jnp
from jax import lax
from jax.experimental import pallas as pl
from jax.experimental.pallas import tpu as pltpu

EPS = 1e-5
LANE = 128
VMEM_LIMIT = 32 * 1024 * 1024   # explicit so v5e's 16 MiB scoped default never binds


# ---------------------------------------------------------------- helpers ----

def _ru(x, m):
    return (x + m - 1) // m * m


def _pick_tm(M, target_rows=4096):
    """Largest band (row tile) dividing M, sublane friendly, <= target_rows.
    Prefers 16-row alignment (bf16 packing) and >= 2 bands (megacore split)."""
    limit = min(M, target_rows)
    for align in (16, 8):
        cands = [d for d in range(align, limit + 1, align) if M % d == 0]
        if cands:
            multi = [d for d in cands if M // d >= 2]
            return max(multi) if multi else max(cands)
    # TODO(synk): zero-pad M to a sublane multiple for awkward N*H*W.
    return M


def _pick_th(H, W, target_rows=2048):
    """Row-band height for the halo'd (9*C > 128) path."""
    def ok(th, m):
        return H % th == 0 and (th * W) % m == 0 and ((th + 2) * W) % m == 0
    for m in (16, 8):
        cands = [th for th in range(1, H + 1) if ok(th, m)]
        if cands:
            fit = [th for th in cands if th * W <= target_rows]
            return max(fit) if fit else min(cands)
    # TODO(synk): width-pad W for shapes where no sublane-aligned band exists.
    return H


def _pack_weight(w_hwio, KP, CP, fold9):
    """(3,3,Cin,Cout) HWIO -> (n_taps*KP, CP) bf16 lane/K-padded weight."""
    KH, KW, Cin, Cout = w_hwio.shape
    if fold9:                                   # all 9 taps live on the K axis
        wf = w_hwio.reshape(KH * KW * Cin, Cout)
        wk = jnp.zeros((KP, CP), jnp.float32).at[:KH * KW * Cin, :Cout].set(wf)
    else:                                       # dx folded, one K block per dy
        wf = w_hwio.reshape(KH, KW * Cin, Cout)
        wk = jnp.zeros((KH, KP, CP), jnp.float32).at[:, :KW * Cin, :Cout].set(wf)
        wk = wk.reshape(KH * KP, CP)
    return wk.astype(jnp.bfloat16)


def _im2col9(a, KP):
    """bf16 (N,H,W,C) with 9*C <= KP: fold all nine taps into the K lane axis.
    No halo rows -> bands are plain contiguous row slabs. Returns (N*H*W, KP)."""
    N, H, W, C = a.shape
    ap = jnp.pad(a, ((0, 0), (1, 1), (1, 1), (0, 0)))
    views = [ap[:, dy:dy + H, dx:dx + W, :] for dy in range(3) for dx in range(3)]
    cols = jnp.concatenate(views, axis=-1)                         # (N,H,W,9C)
    cols = jnp.pad(cols, ((0, 0), (0, 0), (0, 0), (0, KP - 9 * C)))
    return cols.reshape(N * H * W, KP)


def _im2col3_bands(a, th, KP):
    """bf16 (N,H,W,C): dx folded into K, overlapping (th+2)-row halo bands.
    Only used when 9*C > 128. Returns (N*T*(th+2)*W, KP)."""
    N, H, W, C = a.shape
    ap = jnp.pad(a, ((0, 0), (1, 1), (1, 1), (0, 0)))              # (N,H+2,W+2,C)
    cols = jnp.concatenate([ap[:, :, d:d + W, :] for d in range(3)], axis=-1)
    cols = jnp.pad(cols, ((0, 0), (0, 0), (0, 0), (0, KP - 3 * C)))
    T = H // th
    bands = jnp.stack([cols[:, t * th:t * th + th + 2] for t in range(T)], axis=1)
    return bands.reshape(N * T * (th + 2) * W, KP)


def _bn_scale_shift(stats, TM, count, gamma, beta, C):
    """Combine per-band centered partials (Chan) -> folded BN scale/shift."""
    st = stats.reshape(-1, 8, stats.shape[-1])
    s = st[:, 0, :C]                         # (B, C) per-band sums
    q = st[:, 1, :C]                         # (B, C) per-band centered SS
    mean_b = s / TM
    mean = jnp.sum(s, axis=0) / count
    m2 = jnp.sum(q, axis=0) + TM * jnp.sum((mean_b - mean[None, :]) ** 2, axis=0)
    var = jnp.maximum(m2 / count, 0.0)
    scale = gamma * lax.rsqrt(var + EPS)
    shift = beta - mean * scale
    return scale, shift


# ------------------------------------------------------------ Pallas calls ----

def _conv_bn_stats(xt, wk, *, B, TM, TM_IN, KP, CP, n_taps, row_off):
    """3x3 conv as n_taps MXU matmuls per band + per-band centered BN partials.

    Outputs:
      z     : (B*TM, CP) bf16 conv result (lane-padded channels)
      stats : (B*8, CP)  f32; in each 8-row group: row 0 = sum over the band,
                               row 1 = sum of squared deviations from band mean.
    """

    def kernel(xt_ref, wk_ref, z_ref, st_ref):
        acc = jnp.dot(xt_ref[pl.ds(0, TM), :], wk_ref[pl.ds(0, KP), :],
                      preferred_element_type=jnp.float32)
        for t in range(1, n_taps):      # chained f32 accumulation (MRB-friendly)
            acc = acc + jnp.dot(xt_ref[pl.ds(t * row_off, TM), :],
                                wk_ref[pl.ds(t * KP, KP), :],
                                preferred_element_type=jnp.float32)
        z_ref[...] = acc.astype(z_ref.dtype)

        s = jnp.sum(acc, axis=0, keepdims=True)                   # (1, CP)
        mean_b = s * (1.0 / TM)
        q = jnp.sum((acc - mean_b) ** 2, axis=0, keepdims=True)   # (1, CP)
        rows = lax.broadcasted_iota(jnp.int32, (8, CP), 0)
        st_ref[...] = jnp.where(rows == 0, s, 0.0) + jnp.where(rows == 1, q, 0.0)

    return pl.pallas_call(
        kernel,
        out_shape=(jax.ShapeDtypeStruct((B * TM, CP), jnp.bfloat16),
                   jax.ShapeDtypeStruct((B * 8, CP), jnp.float32)),
        grid=(B,),
        in_specs=[pl.BlockSpec((TM_IN, KP), lambda b: (b, 0)),
                  pl.BlockSpec((n_taps * KP, CP), lambda b: (0, 0))],
        out_specs=(pl.BlockSpec((TM, CP), lambda b: (b, 0)),
                   pl.BlockSpec((8, CP), lambda b: (b, 0))),
        compiler_params=pltpu.CompilerParams(
            dimension_semantics=("parallel",),   # per-band partials, no carry
            vmem_limit_bytes=VMEM_LIMIT),
    )(xt, wk)


def _affine_res_relu(z, xres, sc, sh, *, B, TM, CP):
    """out = relu(x_res + z*scale + shift); lane-dense (TM,128) tiles, f32 math."""

    def kernel(z_ref, x_ref, sc_ref, sh_ref, o_ref):
        zf = z_ref[...].astype(jnp.float32)
        xf = x_ref[...].astype(jnp.float32)
        o_ref[...] = jnp.maximum(xf + zf * sc_ref[...] + sh_ref[...], 0.0)

    return pl.pallas_call(
        kernel,
        out_shape=jax.ShapeDtypeStruct((B * TM, CP), jnp.float32),
        grid=(B,),
        in_specs=[pl.BlockSpec((TM, CP), lambda b: (b, 0)),
                  pl.BlockSpec((TM, CP), lambda b: (b, 0)),
                  pl.BlockSpec((1, CP), lambda b: (0, 0)),
                  pl.BlockSpec((1, CP), lambda b: (0, 0))],
        out_specs=pl.BlockSpec((TM, CP), lambda b: (b, 0)),
        compiler_params=pltpu.CompilerParams(
            dimension_semantics=("parallel",),
            vmem_limit_bytes=VMEM_LIMIT),
    )(z, xres, sc, sh)


# ------------------------------------------------------------------ module ----

def residual_block(x_nchw, params):
    """Pallas implementation of ResidualBlock.forward (training-mode BN).
    Input/output are NCHW."""
    w1, b1, g1, bt1, w2, b2, g2, bt2 = params
    # Conv biases are dropped: training-mode BN subtracts the batch mean, which
    # cancels a constant per-channel bias exactly.
    del b1, b2

    N, C, H, W = x_nchw.shape
    M = N * H * W
    CP = _ru(C, LANE)
    fold9 = 9 * C <= LANE                      # all nine taps fit in one K block
    KP = LANE if fold9 else _ru(3 * C, LANE)

    x_nhwc = jnp.transpose(x_nchw, (0, 2, 3, 1)).astype(jnp.float32)
    x_bf = x_nhwc.astype(jnp.bfloat16)
    x_res = jnp.pad(x_bf, ((0, 0), (0, 0), (0, 0), (0, CP - C))).reshape(M, CP)

    if fold9:
        TM = _pick_tm(M)
        B = M // TM
        TM_IN, n_taps, row_off = TM, 1, 0
        build = lambda a: _im2col9(a, KP)
    else:
        th = _pick_th(H, W)
        B = N * (H // th)
        TM, TM_IN, n_taps, row_off = th * W, (th + 2) * W, 3, W
        build = lambda a: _im2col3_bands(a, th, KP)

    wk1 = _pack_weight(w1, KP, CP, fold9)
    wk2 = _pack_weight(w2, KP, CP, fold9)

    # ---- stage 1: conv1 + per-band BN1 partials
    z1, st1 = _conv_bn_stats(build(x_bf), wk1, B=B, TM=TM, TM_IN=TM_IN,
                             KP=KP, CP=CP, n_taps=n_taps, row_off=row_off)
    sc1, sh1 = _bn_scale_shift(st1, TM, float(M), g1, bt1, C)

    # BN1 affine + ReLU as plain jnp so XLA fuses it into the stage-2 im2col
    # gather (no standalone elementwise pass / extra HBM round trip).
    h = jnp.maximum(z1[:, :C].astype(jnp.float32) * sc1[None, :] + sh1[None, :], 0.0)
    h_bf = h.astype(jnp.bfloat16).reshape(N, H, W, C)

    # ---- stage 2: conv2 + per-band BN2 partials, then affine + residual + ReLU
    z2, st2 = _conv_bn_stats(build(h_bf), wk2, B=B, TM=TM, TM_IN=TM_IN,
                             KP=KP, CP=CP, n_taps=n_taps, row_off=row_off)
    sc2, sh2 = _bn_scale_shift(st2, TM, float(M), g2, bt2, C)
    sc2p = jnp.pad(sc2, (0, CP - C)).reshape(1, CP)
    sh2p = jnp.pad(sh2, (0, CP - C)).reshape(1, CP)

    out = _affine_res_relu(z2, x_res, sc2p, sh2p, B=B, TM=TM, CP=CP)
    out = out.reshape(N, H, W, CP)[..., :C]
    return jnp.transpose(out, (0, 3, 1, 2))       # back to NCHW


# ------------------------------------- pure-JAX reference (correctness only) --

def _ref_forward(x_nchw, params):
    w1, b1, g1, bt1, w2, b2, g2, bt2 = params

    def conv(x, w, b):
        y = lax.conv_general_dilated(
            x, w, window_strides=(1, 1), padding="SAME",
            dimension_numbers=("NCHW", "HWIO", "NCHW"))
        return y + b.reshape(1, -1, 1, 1)

    def bn(x, g, bt):
        mean = jnp.mean(x, axis=(0, 2, 3), keepdims=True)
        var = jnp.mean((x - mean) ** 2, axis=(0, 2, 3), keepdims=True)
        return (x - mean) * lax.rsqrt(var + EPS) * g.reshape(1, -1, 1, 1) \
               + bt.reshape(1, -1, 1, 1)

    h = jax.nn.relu(bn(conv(x_nchw, w1, b1), g1, bt1))
    z = bn(conv(h, w2, b2), g2, bt2)
    return jax.nn.relu(x_nchw + z)


# -------------------------------------------------------------------- main ----

if __name__ == "__main__":
    N, C, H, W = 2, 4, 16, 16
    key = jax.random.PRNGKey(0)
    k = jax.random.split(key, 9)

    x = jax.random.normal(k[0], (N, C, H, W), jnp.float32)

    fan = 9 * C
    # conv weights in (KH, KW, Cin, Cout) = HWIO layout
    w1 = jax.random.normal(k[1], (3, 3, C, C), jnp.float32) / jnp.sqrt(fan)
    b1 = jax.random.normal(k[2], (C,), jnp.float32) * 0.1
    w2 = jax.random.normal(k[3], (3, 3, C, C), jnp.float32) / jnp.sqrt(fan)
    b2 = jax.random.normal(k[4], (C,), jnp.float32) * 0.1
    # BatchNorm affine params (perturbed from defaults to exercise them)
    g1 = 1.0 + 0.1 * jax.random.normal(k[5], (C,), jnp.float32)
    bt1 = 0.1 * jax.random.normal(k[6], (C,), jnp.float32)
    g2 = 1.0 + 0.1 * jax.random.normal(k[7], (C,), jnp.float32)
    bt2 = 0.1 * jax.random.normal(k[8], (C,), jnp.float32)

    params = (w1, b1, g1, bt1, w2, b2, g2, bt2)

    fwd = jax.jit(residual_block)
    y = jax.block_until_ready(fwd(x, params))
    y_ref = jax.block_until_ready(_ref_forward(x, params))

    assert y.shape == x.shape, (y.shape, x.shape)
    assert bool(jnp.all(jnp.isfinite(y)))
    # tolerance accounts for bf16 MXU operands and bf16 z / residual stores
    err = float(jnp.max(jnp.abs(y - y_ref)))
    assert bool(jnp.allclose(y, y_ref, atol=5e-2, rtol=5e-2)), err

    print("KERNEL_OK")
</pallas_src>

<mosaic_0001>
module attributes {stable_mosaic.version = 11 : i64} {
  func.func @kernel(%arg0: i32, %arg1: memref<256x128xbf16, #tpu.memory_space<vmem>>, %arg2: memref<128x128xbf16, #tpu.memory_space<vmem>>, %arg3: memref<256x128xbf16, #tpu.memory_space<vmem>>, %arg4: memref<8x128xf32, #tpu.memory_space<vmem>>) attributes {dimension_semantics = [#tpu.dimension_semantics<parallel>], iteration_bounds = array<i64: 2>, scalar_prefetch = 0 : i64, scratch_operands = 0 : i64, tpu.core_type = #tpu.core_type<tc>, window_params = [{transform_indices = @transform_0, window_bounds = array<i64: 256, 128>}, {pipeline_mode = #tpu.pipeline_mode<synchronous>, transform_indices = @transform_1, window_bounds = array<i64: 128, 128>}, {transform_indices = @transform_2, window_bounds = array<i64: 256, 128>}, {transform_indices = @transform_3, window_bounds = array<i64: 8, 128>}]} {
    %c0 = arith.constant 0 : index
    %c0_0 = arith.constant 0 : index
    %0 = vector.load %arg1[%c0, %c0_0] : memref<256x128xbf16, #tpu.memory_space<vmem>>, vector<256x128xbf16>
    %c0_1 = arith.constant 0 : index
    %c0_2 = arith.constant 0 : index
    %1 = vector.load %arg2[%c0_1, %c0_2] : memref<128x128xbf16, #tpu.memory_space<vmem>>, vector<128x128xbf16>
    %cst = arith.constant dense<0.000000e+00> : vector<256x128xf32>
    %2 = tpu.matmul %0, %1, %cst {dimension_numbers = #tpu.dot_dimension_numbers<[1], [0], [0], [1], [0, 0, 1, 1], [], []>} : vector<256x128xbf16>, vector<128x128xbf16>, vector<256x128xf32> -> vector<256x128xf32>
    %3 = arith.truncf %2 : vector<256x128xf32> to vector<256x128xbf16>
    %c0_3 = arith.constant 0 : index
    %c0_4 = arith.constant 0 : index
    %4 = vector.load %arg3[%c0_3, %c0_4] : memref<256x128xbf16, #tpu.memory_space<vmem>>, vector<256x128xbf16>
    tpu.vector_store %arg3[%c0_3, %c0_4], %3 {strides = array<i32>} : memref<256x128xbf16, #tpu.memory_space<vmem>>, vector<256x128xbf16>,
    %cst_5 = arith.constant dense<0.000000e+00> : vector<128xf32>
    %5 = vector.multi_reduction <add>, %2, %cst_5 [0] : vector<256x128xf32> to vector<128xf32>
    %6 = vector.shape_cast %5 : vector<128xf32> to vector<1x128xf32>
    %cst_6 = arith.constant 3.906250e-03 : f32
    %7 = vector.broadcast %cst_6 : f32 to vector<1x128xf32>
    %8 = arith.mulf %6, %7 : vector<1x128xf32>
    %9 = vector.broadcast %8 : vector<1x128xf32> to vector<256x128xf32>
    %10 = arith.subf %2, %9 : vector<256x128xf32>
    %11 = arith.mulf %10, %10 : vector<256x128xf32>
    %cst_7 = arith.constant dense<0.000000e+00> : vector<128xf32>
    %12 = vector.multi_reduction <add>, %11, %cst_7 [0] : vector<256x128xf32> to vector<128xf32>
    %13 = vector.shape_cast %12 : vector<128xf32> to vector<1x128xf32>
    %14 = tpu.iota {dimensions = array<i32: 0>} : vector<8x128xi32>
    %c0_i32 = arith.constant 0 : i32
    %15 = vector.broadcast %c0_i32 : i32 to vector<8x128xi32>
    %16 = arith.cmpi eq, %14, %15 : vector<8x128xi32>
    %cst_8 = arith.constant 0.000000e+00 : f32
    %17 = vector.shape_cast %6 : vector<1x128xf32> to vector<1x128xf32>
    %18 = vector.broadcast %17 : vector<1x128xf32> to vector<8x128xf32>
    %19 = vector.broadcast %cst_8 : f32 to vector<8x128xf32>
    %20 = arith.select %16, %18, %19 : vector<8x128xi1>, vector<8x128xf32>
    %c1_i32 = arith.constant 1 : i32
    %21 = vector.broadcast %c1_i32 : i32 to vector<8x128xi32>
    %22 = arith.cmpi eq, %14, %21 : vector<8x128xi32>
    %cst_9 = arith.constant 0.000000e+00 : f32
    %23 = vector.shape_cast %13 : vector<1x128xf32> to vector<1x128xf32>
    %24 = vector.broadcast %23 : vector<1x128xf32> to vector<8x128xf32>
    %25 = vector.broadcast %cst_9 : f32 to vector<8x128xf32>
    %26 = arith.select %22, %24, %25 : vector<8x128xi1>, vector<8x128xf32>
    %27 = arith.addf %20, %26 : vector<8x128xf32>
    %c0_10 = arith.constant 0 : index
    %c0_11 = arith.constant 0 : index
    %28 = vector.load %arg4[%c0_10, %c0_11] : memref<8x128xf32, #tpu.memory_space<vmem>>, vector<8x128xf32>
    tpu.vector_store %arg4[%c0_10, %c0_11], %27 {strides = array<i32>} : memref<8x128xf32, #tpu.memory_space<vmem>>, vector<8x128xf32>,
    return
  }
  func.func @transform_0(%arg0: i32) -> (i32, i32) {
    %c0_i32 = arith.constant 0 : i32
    %c0_i32_0 = arith.constant 0 : i32
    return %arg0, %c0_i32 : i32, i32
  }
  func.func @transform_1(%arg0: i32) -> (i32, i32) {
    %c0_i32 = arith.constant 0 : i32
    %c0_i32_0 = arith.constant 0 : i32
    %c0_i32_1 = arith.constant 0 : i32
    return %c0_i32, %c0_i32_0 : i32, i32
  }
  func.func @transform_2(%arg0: i32) -> (i32, i32) {
    %c0_i32 = arith.constant 0 : i32
    %c0_i32_0 = arith.constant 0 : i32
    return %arg0, %c0_i32 : i32, i32
  }
  func.func @transform_3(%arg0: i32) -> (i32, i32) {
    %c0_i32 = arith.constant 0 : i32
    %c0_i32_0 = arith.constant 0 : i32
    return %arg0, %c0_i32 : i32, i32
  }
}

module attributes {stable_mosaic.version = 11 : i64} {
  func.func @kernel(%arg0: i32, %arg1: memref<256x128xbf16, #tpu.memory_space<vmem>>, %arg2: memref<256x128xbf16, #tpu.memory_space<vmem>>, %arg3: memref<1x128xf32, #tpu.memory_space<vmem>>, %arg4: memref<1x128xf32, #tpu.memory_space<vmem>>, %arg5: memref<256x128xf32, #tpu.memory_space<vmem>>) attributes {dimension_semantics = [#tpu.dimension_semantics<parallel>], iteration_bounds = array<i64: 2>, scalar_prefetch = 0 : i64, scratch_operands = 0 : i64, tpu.core_type = #tpu.core_type<tc>, window_params = [{transform_indices = @transform_0, window_bounds = array<i64: 256, 128>}, {transform_indices = @transform_1, window_bounds = array<i64: 256, 128>}, {pipeline_mode = #tpu.pipeline_mode<synchronous>, transform_indices = @transform_2, window_bounds = array<i64: 1, 128>}, {pipeline_mode = #tpu.pipeline_mode<synchronous>, transform_indices = @transform_3, window_bounds = array<i64: 1, 128>}, {transform_indices = @transform_4, window_bounds = array<i64: 256, 128>}]} {
    %c0 = arith.constant 0 : index
    %c0_0 = arith.constant 0 : index
    %0 = vector.load %arg1[%c0, %c0_0] : memref<256x128xbf16, #tpu.memory_space<vmem>>, vector<256x128xbf16>
    %1 = arith.extf %0 : vector<256x128xbf16> to vector<256x128xf32>
    %c0_1 = arith.constant 0 : index
    %c0_2 = arith.constant 0 : index
    %2 = vector.load %arg2[%c0_1, %c0_2] : memref<256x128xbf16, #tpu.memory_space<vmem>>, vector<256x128xbf16>
    %3 = arith.extf %2 : vector<256x128xbf16> to vector<256x128xf32>
    %c0_3 = arith.constant 0 : index
    %c0_4 = arith.constant 0 : index
    %4 = vector.load %arg3[%c0_3, %c0_4] : memref<1x128xf32, #tpu.memory_space<vmem>>, vector<1x128xf32>
    %5 = vector.broadcast %4 : vector<1x128xf32> to vector<256x128xf32>
    %6 = arith.mulf %1, %5 : vector<256x128xf32>
    %7 = arith.addf %3, %6 : vector<256x128xf32>
    %c0_5 = arith.constant 0 : index
    %c0_6 = arith.constant 0 : index
    %8 = vector.load %arg4[%c0_5, %c0_6] : memref<1x128xf32, #tpu.memory_space<vmem>>, vector<1x128xf32>
    %9 = vector.broadcast %8 : vector<1x128xf32> to vector<256x128xf32>
    %10 = arith.addf %7, %9 : vector<256x128xf32>
    %cst = arith.constant 0.000000e+00 : f32
    %11 = vector.broadcast %cst : f32 to vector<256x128xf32>
    %12 = arith.maximumf %10, %11 : vector<256x128xf32>
    %c0_7 = arith.constant 0 : index
    %c0_8 = arith.constant 0 : index
    %13 = vector.load %arg5[%c0_7, %c0_8] : memref<256x128xf32, #tpu.memory_space<vmem>>, vector<256x128xf32>
    tpu.vector_store %arg5[%c0_7, %c0_8], %12 {strides = array<i32>} : memref<256x128xf32, #tpu.memory_space<vmem>>, vector<256x128xf32>,
    return
  }
  func.func @transform_0(%arg0: i32) -> (i32, i32) {
    %c0_i32 = arith.constant 0 : i32
    %c0_i32_0 = arith.constant 0 : i32
    return %arg0, %c0_i32 : i32, i32
  }
  func.func @transform_1(%arg0: i32) -> (i32, i32) {
    %c0_i32 = arith.constant 0 : i32
    %c0_i32_0 = arith.constant 0 : i32
    return %arg0, %c0_i32 : i32, i32
  }
  func.func @transform_2(%arg0: i32) -> (i32, i32) {
    %c0_i32 = arith.constant 0 : i32
    %c0_i32_0 = arith.constant 0 : i32
    %c0_i32_1 = arith.constant 0 : i32
    return %c0_i32, %c0_i32_0 : i32, i32
  }
  func.func @transform_3(%arg0: i32) -> (i32, i32) {
    %c0_i32 = arith.constant 0 : i32
    %c0_i32_0 = arith.constant 0 : i32
    %c0_i32_1 = arith.constant 0 : i32
    return %c0_i32, %c0_i32_0 : i32, i32
  }
  func.func @transform_4(%arg0: i32) -> (i32, i32) {
    %c0_i32 = arith.constant 0 : i32
    %c0_i32_0 = arith.constant 0 : i32
    return %arg0, %c0_i32 : i32, i32
  }
}

</mosaic_0001>

<bundles_post_ra>
// kernel: residual_block.3
= control target key start
LH: loop header
LB: loop body
LE: loop exit
PB: predicated region body
PF: predicated region fallthrough
CT: control target
= control target key end

     0   :  { %s1276_s12 = smov 0   ;;  %s1507_s0 = inlined_call_operand.vmem [shape: bf16[512,128], index: 0, kind: input, shape index: {}]   ;;  %s1508_s1 = inlined_call_operand.vmem [shape: bf16[128,128], index: 1, kind: input, shape index: {}]   ;;  %s1509_s2 = inlined_call_operand.vmem [shape: bf16[512,128], index: 2, kind: output, shape index: {0}]   ;;  %s1510_s3 = inlined_call_operand.vmem [shape: f32[16,128], index: 3, kind: output, shape index: {1}]  }
   0x1 LB: > { %s1282_s13 = sadd.s32 4294967295, %s1254_s12   ;;  %p937_p0 = scmp.ge.s32.totalorder %s1254_s12, 1  ;;  %s1254_s12 = sphi %s1276_s12, %s14_s12  }
   0x2   : > { %p141_p1 = scmp.lt.s32.totalorder %s1254_s12, 3 }
   0x4   : > { %p142_p2 = pnand %p937_p0, %p141_p1 }
   0x5   : > { %v1224_v0 = vld [vmem:[%s1508_s1] sm:$0xff] (!%p142_p2)   ;;  %s938_s16 = sshll.u32 (!%p142_p2), %s1282_s13, 5  ;;  %v1225_v1 = vld [vmem:[%s1508_s1 + $0x8] sm:$0xff] (!%p142_p2)   ;;  %v1226_v2 = vld [vmem:[%s1508_s1 + $0x10] sm:$0xff] (!%p142_p2)   ;;  %p181_p4 = scmp.lt.s32.totalorder (!%p142_p2), %s1282_s13, 1 }
   0x6   : > { %145 = sbr.rel (%p142_p2) target bundleno = 417 (0x1a1), region = 28  ;;  %p170_p3 = scmp.lt.s32.totalorder (!%p142_p2), %s938_s16, 63  ;;  %1152 = vmatprep.subr.bf16.mxu0 (!%p142_p2), %v1224_v0  ;;  %1200 = vmatprep.subr.bf16.mxu1 (!%p142_p2), %v1224_v0  ;;  %v1227_v3 = vld [vmem:[%s1508_s1 + $0x18] sm:$0xff] (!%p142_p2)   ;;  %v1228_v5 = vld [vmem:[%s1508_s1 + $0x20] sm:$0xff] (!%p142_p2)   ;;  %v1229_v6 = vld [vmem:[%s1508_s1 + $0x28] sm:$0xff] (!%p142_p2)  }
   0x7   : > { %1153 = vmatpush3.bf16.msra.mxu0 (!%p142_p2), %v1224_v0  ;;  %1208 = vmatpush3.bf16.msra.mxu1 (!%p142_p2), %v1224_v0  ;;  %v1230_v8 = vld [vmem:[%s1508_s1 + $0x30] sm:$0xff] (!%p142_p2)   ;;  %v1231_v9 = vld [vmem:[%s1508_s1 + $0x38] sm:$0xff] (!%p142_p2)  }
   0x8   : > { %1154 = vmatprep.subr.bf16.mxu0 (!%p142_p2), %v1225_v1  ;;  %1201 = vmatprep.subr.bf16.mxu1 (!%p142_p2), %v1225_v1 }
   0xb   : > { %1155 = vmatpush3.bf16.msra.mxu0 (!%p142_p2), %v1225_v1  ;;  %1209 = vmatpush3.bf16.msra.mxu1 (!%p142_p2), %v1225_v1 }
   0xc   : > { %1156 = vmatprep.subr.bf16.mxu0 (!%p142_p2), %v1226_v2  ;;  %1202 = vmatprep.subr.bf16.mxu1 (!%p142_p2), %v1226_v2 }
   0xd   : > { %s1512_s16 = smov (!%p170_p3, %s938_s16), 63  ;;  %s1514_s13 = smov (!%p181_p4, %s1282_s13), 1 }
   0xe   : > { %s939_s21 = sshll.u32 %s1512_s16, 2  ;;  %s942_s11 = sshll.u32 %s1514_s13, 3 }
   0xf   : > { %s1304_s24 = scalar_lea.vmem %s1507_s0, %s939_s21  ;;  %1157 = vmatpush3.bf16.msra.mxu0 %v1226_v2  ;;  %1210 = vmatpush3.bf16.msra.mxu1 %v1226_v2  ;;  %s1350_s10 = scalar_lea.vmem %s1509_s2, %s939_s21 }
  0x10   : > { %v1232_v4 = vld [vmem:[%s1304_s24] sm:$0xff]   ;;  %1158 = vmatprep.subr.bf16.mxu0 %v1227_v3  ;;  %1203 = vmatprep.subr.bf16.mxu1 %v1227_v3  ;;  %v1233_v10 = vld [vmem:[%s1304_s24 + $0x8] sm:$0xff]   ;;  %v1234_v12 = vld [vmem:[%s1304_s24 + $0x10] sm:$0xff]   ;;  %s184_s16 = scalar_lea.vmem %s1510_s3, %s942_s11 }
  0x11   : > { %1168 = vmatprep.mubr.bf16.mxu0 %v1232_v4  ;;  %v1240_v7 = vld [vmem:[%s1304_s24 + $0x40] sm:$0xff]   ;;  %v1241_v11 = vld [vmem:[%s1304_s24 + $0x48] sm:$0xff]   ;;  %v1242_v13 = vld [vmem:[%s1304_s24 + $0x50] sm:$0xff]  }
  0x12   : > { %1184 = vmatprep.mubr.bf16.mxu1 %v1240_v7  ;;  %v1235_v14 = vld [vmem:[%s1304_s24 + $0x18] sm:$0xff]   ;;  %v1236_v16 = vld [vmem:[%s1304_s24 + $0x20] sm:$0xff]   ;;  %v1237_v18 = vld [vmem:[%s1304_s24 + $0x28] sm:$0xff]  }
  0x13   : > { %1159 = vmatpush3.bf16.msra.mxu0 %v1227_v3  ;;  %1211 = vmatpush3.bf16.msra.mxu1 %v1227_v3  ;;  %v1243_v15 = vld [vmem:[%s1304_s24 + $0x58] sm:$0xff]   ;;  %v1244_v17 = vld [vmem:[%s1304_s24 + $0x60] sm:$0xff]   ;;  %v1245_v19 = vld [vmem:[%s1304_s24 + $0x68] sm:$0xff]  }
  0x14   : > { %1160 = vmatprep.subr.bf16.mxu0 %v1228_v5  ;;  %1204 = vmatprep.subr.bf16.mxu1 %v1228_v5  ;;  %v1238_v20 = vld [vmem:[%s1304_s24 + $0x30] sm:$0xff]   ;;  %v1239_v22 = vld [vmem:[%s1304_s24 + $0x38] sm:$0xff]  }
  0x15   : > { %v1246_v21 = vld [vmem:[%s1304_s24 + $0x70] sm:$0xff]   ;;  %v1247_v23 = vld [vmem:[%s1304_s24 + $0x78] sm:$0xff]  }
  0x17   : > { %1161 = vmatpush3.bf16.msra.mxu0 %v1228_v5  ;;  %1212 = vmatpush3.bf16.msra.mxu1 %v1228_v5 }
  0x18   : > { %1162 = vmatprep.subr.bf16.mxu0 %v1229_v6  ;;  %1205 = vmatprep.subr.bf16.mxu1 %v1229_v6 }
  0x1b   : > { %1163 = vmatpush3.bf16.msra.mxu0 %v1229_v6  ;;  %1213 = vmatpush3.bf16.msra.mxu1 %v1229_v6 }
  0x1c   : > { %1164 = vmatprep.subr.bf16.mxu0 %v1230_v8  ;;  %1206 = vmatprep.subr.bf16.mxu1 %v1230_v8 }
  0x1f   : > { %1165 = vmatpush3.bf16.msra.mxu0 %v1230_v8  ;;  %1214 = vmatpush3.bf16.msra.mxu1 %v1230_v8 }
  0x20   : > { %1166 = vmatprep.subr.bf16.mxu0 %v1231_v9  ;;  %1207 = vmatprep.subr.bf16.mxu1 %v1231_v9 }
  0x23   : > { %1167 = vmatpush3.bf16.msra.mxu0 %v1231_v9  ;;  %1215 = vmatpush3.bf16.msra.mxu1 %v1231_v9 }
  0x26   : > { %1169 = vmatmul.mubr.bf16.vlgmr.msra.gmra.mrb[0].mxu0 %v1233_v10  ;;  %1185 = vmatmul.mubr.bf16.vlgmr.msra.gmra.mrb[0].mxu1 %v1241_v11 }
  0x27   : > { %1172 = vmatprep.mubr.bf16.mxu0 %v1234_v12  ;;  %1188 = vmatprep.mubr.bf16.mxu1 %v1242_v13 }
  0x2e   : > { %1173 = vmatmul.mubr.bf16.gmra.mrb[4].mxu0 %v1235_v14  ;;  %1189 = vmatmul.mubr.bf16.gmra.mrb[4].mxu1 %v1243_v15 }
  0x2f   : > { %1176 = vmatprep.mubr.bf16.mxu0 %v1236_v16  ;;  %1192 = vmatprep.mubr.bf16.mxu1 %v1244_v17 }
  0x36   : > { %1177 = vmatmul.mubr.bf16.gmra.mrb[8].mxu0 %v1237_v18  ;;  %1193 = vmatmul.mubr.bf16.gmra.mrb[8].mxu1 %v1245_v19 }
  0x37   : > { %1180 = vmatprep.mubr.bf16.mxu0 %v1238_v20  ;;  %1196 = vmatprep.mubr.bf16.mxu1 %v1246_v21 }
  0x3e   : > { %1181 = vmatmul.mubr.bf16.gmra.mrb[12].mxu0 %v1239_v22  ;;  %1197 = vmatmul.mubr.bf16.gmra.mrb[12].mxu1 %v1247_v23 }
  0xf9   : > { %v1337_v24 = vpop.f32.mrb[0].mxu0  ;;  %v1339_v25 = vpop.f32.mrb[0].mxu1 }
  0xfa   : > { %v1341_v26 = vpop.f32.mrb[1].mxu0  ;;  %v1343_v27 = vpop.f32.mrb[1].mxu1 }
  0xfb   : > { %v1352_v28 = vpop.f32.mrb[2].mxu0  ;;  %v1354_v29 = vpop.f32.mrb[2].mxu1 }
  0xfc   : > { %v1041_v30 = vpack.c.bf16 %v1352_v28, %v1337_v24  ;;  %v1358_v31 = vpop.f32.mrb[3].mxu0  ;;  %v1081_v32 = vpack.c.bf16 %v1354_v29, %v1339_v25  ;;  %v1362_v33 = vpop.f32.mrb[3].mxu1 }
  0xfd   : > { %v1036_v34 = vpack.c.bf16 %v1358_v31, %v1341_v26  ;;  %v699_v35 = vadd.f32 %v1358_v31, %v1341_v26  ;;  %v1076_v36 = vpack.c.bf16 %v1362_v33, %v1343_v27 }
  0xfe   : > { %1113 = vst [vmem:[%s1350_s10 + $0x8] sm:$0xff] %v1041_v30   ;;  %1121 = vst [vmem:[%s1350_s10 + $0x48] sm:$0xff] %v1081_v32  }
  0xff   : > { %1037 = vst [vmem:[%s1350_s10] sm:$0xff] %v1036_v34   ;;  %v700_v37 = vadd.f32 %v1337_v24, %v699_v35  ;;  %1120 = vst [vmem:[%s1350_s10 + $0x40] sm:$0xff] %v1076_v36  }
 0x101   : > { %v1375_v38 = vpop.f32.mrb[4].mxu0  ;;  %v701_v39 = vadd.f32 %v1352_v28, %v700_v37  ;;  %v1378_v40 = vpop.f32.mrb[4].mxu1 }
 0x102   : > { %v1380_v41 = vpop.f32.mrb[5].mxu0  ;;  %v1382_v42 = vpop.f32.mrb[5].mxu1 }
 0x103   : > { %v702_v43 = vadd.f32 %v701_v39, %v1380_v41  ;;  %v1385_v44 = vpop.f32.mrb[6].mxu0  ;;  %v1387_v45 = vpop.f32.mrb[6].mxu1 }
 0x104   : > { %v1051_v46 = vpack.c.bf16 %v1385_v44, %v1375_v38  ;;  %v1391_v47 = vpop.f32.mrb[7].mxu0  ;;  %v1091_v48 = vpack.c.bf16 %v1387_v45, %v1378_v40  ;;  %v1395_v49 = vpop.f32.mrb[7].mxu1 }
 0x105   : > { %v1046_v50 = vpack.c.bf16 %v1391_v47, %v1380_v41  ;;  %v703_v51 = vadd.f32 %v702_v43, %v1391_v47  ;;  %v1086_v52 = vpack.c.bf16 %v1395_v49, %v1382_v42 }
 0x106   : > { %1115 = vst [vmem:[%s1350_s10 + $0x18] sm:$0xff] %v1051_v46   ;;  %1123 = vst [vmem:[%s1350_s10 + $0x58] sm:$0xff] %v1091_v48  }
 0x107   : > { %1114 = vst [vmem:[%s1350_s10 + $0x10] sm:$0xff] %v1046_v50   ;;  %v704_v53 = vadd.f32 %v1375_v38, %v703_v51  ;;  %1122 = vst [vmem:[%s1350_s10 + $0x50] sm:$0xff] %v1086_v52  }
 0x109   : > { %v1407_v54 = vpop.f32.mrb[8].mxu0  ;;  %v705_v55 = vadd.f32 %v1385_v44, %v704_v53  ;;  %v1410_v56 = vpop.f32.mrb[8].mxu1 }
 0x10a   : > { %v1412_v57 = vpop.f32.mrb[9].mxu0  ;;  %v1414_v58 = vpop.f32.mrb[9].mxu1 }
 0x10b   : > { %v706_v59 = vadd.f32 %v705_v55, %v1412_v57  ;;  %v1417_v60 = vpop.f32.mrb[10].mxu0  ;;  %v1419_v61 = vpop.f32.mrb[10].mxu1 }
 0x10c   : > { %v1061_v62 = vpack.c.bf16 %v1417_v60, %v1407_v54  ;;  %v1423_v63 = vpop.f32.mrb[11].mxu0  ;;  %v1101_v0 = vpack.c.bf16 %v1419_v61, %v1410_v56  ;;  %v1427_v1 = vpop.f32.mrb[11].mxu1 }
 0x10d   : > { %v1056_v2 = vpack.c.bf16 %v1423_v63, %v1412_v57  ;;  %v707_v3 = vadd.f32 %v706_v59, %v1423_v63  ;;  %v1096_v4 = vpack.c.bf16 %v1427_v1, %v1414_v58 }
 0x10e   : > { %1117 = vst [vmem:[%s1350_s10 + $0x28] sm:$0xff] %v1061_v62   ;;  %1125 = vst [vmem:[%s1350_s10 + $0x68] sm:$0xff] %v1101_v0  }
 0x10f   : > { %1116 = vst [vmem:[%s1350_s10 + $0x20] sm:$0xff] %v1056_v2   ;;  %v708_v5 = vadd.f32 %v1407_v54, %v707_v3  ;;  %1124 = vst [vmem:[%s1350_s10 + $0x60] sm:$0xff] %v1096_v4  }
 0x111   : > { %v1182_v6 = vpop.f32.mrb[12].mxu0  ;;  %v709_v7 = vadd.f32 %v1417_v60, %v708_v5  ;;  %v1440_v8 = vpop.f32.mrb[12].mxu1 }
 0x112   : > { %v460_v9 = vpop.f32.mrb[13].mxu0  ;;  %v1442_v10 = vpop.f32.mrb[13].mxu1 }
 0x113   : > { %v710_v11 = vadd.f32 %v709_v7, %v460_v9  ;;  %v1183_v12 = vpop.f32.mrb[14].mxu0  ;;  %v1444_v13 = vpop.f32.mrb[14].mxu1 }
 0x114   : > { %v1071_v14 = vpack.c.bf16 %v1183_v12, %v1182_v6  ;;  %v463_v15 = vpop.f32.mrb[15].mxu0  ;;  %v1111_v16 = vpack.c.bf16 %v1444_v13, %v1440_v8  ;;  %v527_v17 = vpop.f32.mrb[15].mxu1 }
 0x115   : > { %v1066_v18 = vpack.c.bf16 %v463_v15, %v460_v9  ;;  %v711_v19 = vadd.f32 %v710_v11, %v463_v15  ;;  %v1106_v20 = vpack.c.bf16 %v527_v17, %v1442_v10 }
 0x116   : > { %1119 = vst [vmem:[%s1350_s10 + $0x38] sm:$0xff] %v1071_v14   ;;  %1127 = vst [vmem:[%s1350_s10 + $0x78] sm:$0xff] %v1111_v16  }
 0x117   : > { %1118 = vst [vmem:[%s1350_s10 + $0x30] sm:$0xff] %v1066_v18   ;;  %v712_v21 = vadd.f32 %v1182_v6, %v711_v19  ;;  %1126 = vst [vmem:[%s1350_s10 + $0x70] sm:$0xff] %v1106_v20  }
 0x119   : > { %v713_v22 = vadd.f32 %v1183_v12, %v712_v21 }
 0x11b   : > { %v714_v23 = vadd.f32 %v713_v22, %v1343_v27 }
 0x11d   : > { %v715_v30 = vadd.f32 %v714_v23, %v1362_v33 }
 0x11f   : > { %v716_v32 = vadd.f32 %v1339_v25, %v715_v30 }
 0x121   : > { %v717_v34 = vadd.f32 %v1354_v29, %v716_v32 }
 0x123   : > { %v718_v35 = vadd.f32 %v717_v34, %v1382_v42 }
 0x125   : > { %v719_v36 = vadd.f32 %v718_v35, %v1395_v49 }
 0x127   : > { %v720_v37 = vadd.f32 %v1378_v40, %v719_v36 }
 0x129   : > { %v721_v39 = vadd.f32 %v1387_v45, %v720_v37 }
 0x12b   : > { %v722_v43 = vadd.f32 %v721_v39, %v1414_v58 }
 0x12d   : > { %v723_v46 = vadd.f32 %v722_v43, %v1427_v1 }
 0x12f   : > { %v724_v48 = vadd.f32 %v1410_v56, %v723_v46 }
 0x131   : > { %v725_v50 = vadd.f32 %v1419_v61, %v724_v48 }
 0x133   : > { %v726_v51 = vadd.f32 %v725_v50, %v1442_v10 }
 0x135   : > { %v727_v52 = vadd.f32 %v726_v51, %v527_v17 }
 0x137   : > { %v728_v53 = vadd.f32 %v1440_v8, %v727_v52 }
 0x139   : > { %v729_v55 = vadd.f32 %v1444_v13, %v728_v53 }
 0x13b   : > { %v730_v59 = vrot.slane %v729_v55, 4 }
 0x13d   : > { %v731_v62 = vadd.f32 %v730_v59, %v729_v55 }
 0x13f   : > { %v732_v0 = vrot.slane %v731_v62, 2 }
 0x141   : > { %v733_v2 = vadd.f32 %v732_v0, %v731_v62 }
 0x143   : > { %v734_v3 = vrot.slane %v733_v2, 1 }
 0x145   : > { %v1468_v4 = vadd.f32 %v734_v3, %v733_v2 }
 0x147   : > { %v736_v5 = vmul.f32 0.00390625, %v1468_v4 }
 0x149   : > { %v737_v7 = vsub.f32 %v1341_v26, %v736_v5  ;;  %v738_v11 = vsub.f32 %v1358_v31, %v736_v5  ;;  %v739_v14 = vsub.f32 %v1337_v24, %v736_v5  ;;  %v740_v16 = vsub.f32 %v1352_v28, %v736_v5 }
 0x14a   : > { %v741_v18 = vsub.f32 %v1380_v41, %v736_v5  ;;  %v742_v19 = vsub.f32 %v1391_v47, %v736_v5  ;;  %v743_v20 = vsub.f32 %v1375_v38, %v736_v5  ;;  %v744_v21 = vsub.f32 %v1385_v44, %v736_v5 }
 0x14b   : > { %v745_v22 = vsub.f32 %v1412_v57, %v736_v5  ;;  %v746_v23 = vsub.f32 %v1423_v63, %v736_v5  ;;  %v747_v26 = vsub.f32 %v1407_v54, %v736_v5  ;;  %v748_v31 = vsub.f32 %v1417_v60, %v736_v5 }
 0x14c   : > { %v749_v30 = vsub.f32 %v460_v9, %v736_v5  ;;  %v750_v24 = vsub.f32 %v463_v15, %v736_v5  ;;  %v751_v32 = vsub.f32 %v1182_v6, %v736_v5  ;;  %v752_v28 = vsub.f32 %v1183_v12, %v736_v5 }
 0x14d   : > { %v753_v41 = vsub.f32 %v1343_v27, %v736_v5  ;;  %v754_v47 = vsub.f32 %v1362_v33, %v736_v5  ;;  %v755_v38 = vsub.f32 %v1339_v25, %v736_v5  ;;  %v756_v44 = vsub.f32 %v1354_v29, %v736_v5 }
 0x14e   : > { %v757_v57 = vsub.f32 %v1382_v42, %v736_v5  ;;  %v758_v63 = vsub.f32 %v1395_v49, %v736_v5  ;;  %v759_v54 = vsub.f32 %v1378_v40, %v736_v5  ;;  %v760_v60 = vsub.f32 %v1387_v45, %v736_v5 }
 0x14f   : > { %v761_v9 = vsub.f32 %v1414_v58, %v736_v5  ;;  %v762_v6 = vsub.f32 %v1427_v1, %v736_v5  ;;  %v763_v27 = vsub.f32 %v1410_v56, %v736_v5  ;;  %v764_v33 = vsub.f32 %v1419_v61, %v736_v5 }
 0x150   : > { %v765_v25 = vsub.f32 %v1442_v10, %v736_v5  ;;  %v766_v12 = vsub.f32 %v527_v17, %v736_v5  ;;  %v767_v29 = vsub.f32 %v1440_v8, %v736_v5  ;;  %v768_v42 = vsub.f32 %v1444_v13, %v736_v5 }
 0x151   : > { %v769_v49 = vmul.f32 %v737_v7, %v737_v7  ;;  %v770_v15 = vmul.f32 %v738_v11, %v738_v11  ;;  %v771_v40 = vmul.f32 %v739_v14, %v739_v14  ;;  %v772_v45 = vmul.f32 %v740_v16, %v740_v16 }
 0x152   : > { %v773_v58 = vmul.f32 %v741_v18, %v741_v18  ;;  %v774_v1 = vmul.f32 %v742_v19, %v742_v19  ;;  %v775_v56 = vmul.f32 %v743_v20, %v743_v20  ;;  %v776_v61 = vmul.f32 %v744_v21, %v744_v21 }
 0x153   : > { %v801_v34 = vadd.f32 %v770_v15, %v769_v49  ;;  %v777_v10 = vmul.f32 %v745_v22, %v745_v22  ;;  %v778_v46 = vmul.f32 %v746_v23, %v746_v23  ;;  %v779_v48 = vmul.f32 %v747_v26, %v747_v26 }
 0x154   : > { %v780_v50 = vmul.f32 %v748_v31, %v748_v31  ;;  %v781_v52 = vmul.f32 %v749_v30, %v749_v30  ;;  %v782_v55 = vmul.f32 %v750_v24, %v750_v24  ;;  %v783_v62 = vmul.f32 %v751_v32, %v751_v32 }
 0x155   : > { %v802_v35 = vadd.f32 %v801_v34, %v771_v40  ;;  %v784_v2 = vmul.f32 %v752_v28, %v752_v28  ;;  %v785_v5 = vmul.f32 %v753_v41, %v753_v41  ;;  %v786_v11 = vmul.f32 %v754_v47, %v754_v47 }
 0x156   : > { %v787_v16 = vmul.f32 %v755_v38, %v755_v38  ;;  %v788_v19 = vmul.f32 %v756_v44, %v756_v44  ;;  %v789_v21 = vmul.f32 %v757_v57, %v757_v57  ;;  %v790_v23 = vmul.f32 %v758_v63, %v758_v63 }
 0x157   : > { %v803_v36 = vadd.f32 %v802_v35, %v772_v45  ;;  %v791_v31 = vmul.f32 %v759_v54, %v759_v54  ;;  %v792_v24 = vmul.f32 %v760_v60, %v760_v60  ;;  %v793_v32 = vmul.f32 %v761_v9, %v761_v9 }
 0x158   : > { %v794_v28 = vmul.f32 %v762_v6, %v762_v6  ;;  %v795_v40 = vmul.f32 %v763_v27, %v763_v27  ;;  %v796_v34 = vmul.f32 %v764_v33, %v764_v33  ;;  %v797_v44 = vmul.f32 %v765_v25, %v765_v25 }
 0x159   : > { %v804_v37 = vadd.f32 %v803_v36, %v773_v58  ;;  %v798_v57 = vmul.f32 %v766_v12, %v766_v12  ;;  %v799_v63 = vmul.f32 %v767_v29, %v767_v29  ;;  %v800_v54 = vmul.f32 %v768_v42, %v768_v42 }
 0x15a   : > { %v838_v9 = vlaneseq }
 0x15b   : > { %v805_v39 = vadd.f32 %v804_v37, %v774_v1 }
 0x15c   : > { %v839_v27 = vshrl.u32 %v838_v9, 7 }
 0x15d   : > { %v806_v43 = vadd.f32 %v805_v39, %v775_v56 }
 0x15e   : > { %vm840_vm0 = vcmp.eq.s32.totalorder %v839_v27, 0  ;;  %vm842_vm1 = vcmp.eq.s32.totalorder %v839_v27, 1 }
 0x15f   : > { %v807_v17 = vadd.f32 %v806_v43, %v776_v61  ;;  %v841_v12 = vsel %vm840_vm0, %v1468_v4, 0.0 }
 0x161   : > { %v808_v8 = vadd.f32 %v807_v17, %v777_v10 }
 0x163   : > { %v809_v13 = vadd.f32 %v808_v8, %v778_v46 }
 0x165   : > { %v810_v51 = vadd.f32 %v809_v13, %v779_v48 }
 0x167   : > { %v811_v53 = vadd.f32 %v810_v51, %v780_v50 }
 0x169   : > { %v812_v59 = vadd.f32 %v811_v53, %v781_v52 }
 0x16b   : > { %v813_v0 = vadd.f32 %v812_v59, %v782_v55 }
 0x16d   : > { %v814_v3 = vadd.f32 %v813_v0, %v783_v62 }
 0x16f   : > { %v815_v7 = vadd.f32 %v814_v3, %v784_v2 }
 0x171   : > { %v816_v14 = vadd.f32 %v815_v7, %v785_v5 }
 0x173   : > { %v817_v18 = vadd.f32 %v816_v14, %v786_v11 }
 0x175   : > { %v818_v20 = vadd.f32 %v817_v18, %v787_v16 }
 0x177   : > { %v819_v22 = vadd.f32 %v818_v20, %v788_v19 }
 0x179   : > { %v820_v26 = vadd.f32 %v819_v22, %v789_v21 }
 0x17b   : > { %v821_v30 = vadd.f32 %v820_v26, %v790_v23 }
 0x17d   : > { %v822_v49 = vadd.f32 %v821_v30, %v791_v31 }
 0x17f   : > { %v823_v15 = vadd.f32 %v822_v49, %v792_v24 }
 0x181   : > { %v824_v41 = vadd.f32 %v823_v15, %v793_v32 }
 0x183   : > { %v825_v47 = vadd.f32 %v824_v41, %v794_v28 }
 0x185   : > { %v826_v38 = vadd.f32 %v825_v47, %v795_v40 }
 0x187   : > { %v827_v45 = vadd.f32 %v826_v38, %v796_v34 }
 0x189   : > { %v828_v35 = vadd.f32 %v827_v45, %v797_v44 }
 0x18b   : > { %v829_v58 = vadd.f32 %v828_v35, %v798_v57 }
 0x18d   : > { %v830_v36 = vadd.f32 %v829_v58, %v799_v63 }
 0x18f   : > { %v831_v60 = vadd.f32 %v830_v36, %v800_v54 }
 0x191   : > { %v832_v1 = vrot.slane %v831_v60, 4 }
 0x193   : > { %v833_v6 = vadd.f32 %v832_v1, %v831_v60 }
 0x195   : > { %v834_v37 = vrot.slane %v833_v6, 2 }
 0x197   : > { %v835_v56 = vadd.f32 %v834_v37, %v833_v6 }
 0x199   : > { %v836_v33 = vrot.slane %v835_v56, 1 }
 0x19b   : > { %v837_v25 = vadd.f32 %v836_v33, %v835_v56 }
 0x19d   : > { %v843_v29 = vsel %vm842_vm1, %v837_v25, 0.0 }
 0x19e   : > { %v844_v42 = vadd.f32 %v843_v29, %v841_v12 }
 0x1a0   : > { %845 = vst [vmem:[%s184_s16] sm:$0xff] %v844_v42 }
 0x1a1 PF: > { %s14_s12 = sadd.s32 1, %s1254_s12  }
 0x1a2   : > { %p11_p5 = scmp.ge.s32.totalorder %s14_s12, 4  }
 0x1a4   :  { %13 = sbr.rel (!%p11_p5) target bundleno = 1 (0x1), region = 70 }

// kernel: residual_block.5
= control target key start
LH: loop header
LB: loop body
LE: loop exit
PB: predicated region body
PF: predicated region fallthrough
CT: control target
= control target key end

     0   :  { %s807_s15 = smov 0   ;;  %s975_s0 = inlined_call_operand.vmem [shape: bf16[512,128], index: 0, kind: input, shape index: {}]   ;;  %s976_s1 = inlined_call_operand.vmem [shape: bf16[512,128], index: 1, kind: input, shape index: {}]   ;;  %s977_s2 = inlined_call_operand.vmem [shape: f32[1,128], index: 2, kind: input, shape index: {}]   ;;  %s978_s3 = inlined_call_operand.vmem [shape: f32[1,128], index: 3, kind: input, shape index: {}]   ;;  %s979_s4 = inlined_call_operand.vmem [shape: f32[512,128], index: 4, kind: output, shape index: {}]  }
   0x1 LB: > { %s593_s16 = sadd.s32 4294967295, %s780_s15   ;;  %p597_p0 = scmp.ge.s32.totalorder %s780_s15, 1  ;;  %s780_s15 = sphi %s807_s15, %s14_s15  }
   0x2   : > { %p174_p1 = scmp.lt.s32.totalorder %s780_s15, 3 }
   0x4   : > { %p175_p2 = pnand %p597_p0, %p174_p1 }
   0x5   : > { %s598_s17 = sshll.u32 (!%p175_p2), %s593_s16, 5  ;;  %v831_v0 = vld [vmem:[%s977_s2] ss:$0 sm:$0xff] (!%p175_p2) }
   0x6   : > { %178 = sbr.rel (%p175_p2) target bundleno = 71 (0x47), region = 36  ;;  %p206_p3 = scmp.lt.s32.totalorder (!%p175_p2), %s598_s17, 63  ;;  %v846_v21 = vld [vmem:[%s978_s3] ss:$0 sm:$0xff] (!%p175_p2) }
   0xd   : > { %s981_s17 = smov (!%p206_p3, %s598_s17), 63 }
   0xe   : > { %s599_s18 = sshll.u32 %s981_s17, 2  ;;  %s603_s29 = sshll.u32 %s981_s17, 3 }
   0xf   : > { %s821_s21 = scalar_lea.vmem %s975_s0, %s599_s18  ;;  %s826_s24 = scalar_lea.vmem %s976_s1, %s599_s18 }
  0x10   : > { %v609_v1 = vld [vmem:[%s821_s21] sm:$0xff]   ;;  %v736_v3 = vld [vmem:[%s821_s21 + $0x8] sm:$0xff]   ;;  %v737_v9 = vld [vmem:[%s821_s21 + $0x10] sm:$0xff]   ;;  %s859_s6 = scalar_lea.vmem %s979_s4, %s603_s29 }
  0x11   : > { %v673_v2 = vld [vmem:[%s826_s24] sm:$0xff]   ;;  %v610_v4 = vunpack.c.l.bf16 %v609_v1  ;;  %v611_v6 = vunpack.c.h.bf16 %v609_v1  ;;  %v751_v8 = vld [vmem:[%s826_s24 + $0x8] sm:$0xff]   ;;  %v752_v10 = vld [vmem:[%s826_s24 + $0x10] sm:$0xff]   ;;  %v614_v11 = vunpack.c.l.bf16 %v736_v3  ;;  %v615_v13 = vunpack.c.h.bf16 %v736_v3 }
  0x12   : > { %v674_v5 = vunpack.c.l.bf16 %v673_v2  ;;  %v675_v7 = vunpack.c.h.bf16 %v673_v2  ;;  %v678_v12 = vunpack.c.l.bf16 %v751_v8  ;;  %v679_v14 = vunpack.c.h.bf16 %v751_v8  ;;  %v738_v15 = vld [vmem:[%s821_s21 + $0x18] sm:$0xff]   ;;  %v739_v42 = vld [vmem:[%s821_s21 + $0x20] sm:$0xff]   ;;  %v740_v52 = vld [vmem:[%s821_s21 + $0x28] sm:$0xff]  }
  0x13   : > { %v358_v16 = vmul.f32 %v610_v4, %v831_v0  ;;  %v359_v17 = vmul.f32 %v611_v6, %v831_v0  ;;  %v618_v18 = vunpack.c.l.bf16 %v737_v9  ;;  %v682_v19 = vunpack.c.l.bf16 %v752_v10  ;;  %v753_v20 = vld [vmem:[%s826_s24 + $0x18] sm:$0xff]   ;;  %v754_v47 = vld [vmem:[%s826_s24 + $0x20] sm:$0xff]   ;;  %v755_v57 = vld [vmem:[%s826_s24 + $0x28] sm:$0xff]  }
  0x14   : > { %v360_v22 = vmul.f32 %v614_v11, %v831_v0  ;;  %v361_v23 = vmul.f32 %v615_v13, %v831_v0  ;;  %v619_v24 = vunpack.c.h.bf16 %v737_v9  ;;  %v683_v25 = vunpack.c.h.bf16 %v752_v10  ;;  %v741_v62 = vld [vmem:[%s821_s21 + $0x30] sm:$0xff]  }
  0x15   : > { %v390_v26 = vadd.f32 %v674_v5, %v358_v16  ;;  %v391_v27 = vadd.f32 %v675_v7, %v359_v17  ;;  %v362_v28 = vmul.f32 %v618_v18, %v831_v0  ;;  %v622_v29 = vunpack.c.l.bf16 %v738_v15  ;;  %v756_v4 = vld [vmem:[%s826_s24 + $0x30] sm:$0xff]   ;;  %v742_v17 = vld [vmem:[%s821_s21 + $0x38] sm:$0xff]  }
  0x16   : > { %v392_v30 = vadd.f32 %v678_v12, %v360_v22  ;;  %v393_v31 = vadd.f32 %v679_v14, %v361_v23  ;;  %v363_v32 = vmul.f32 %v619_v24, %v831_v0  ;;  %v686_v33 = vunpack.c.l.bf16 %v753_v20  ;;  %v757_v23 = vld [vmem:[%s826_s24 + $0x38] sm:$0xff]  }
  0x17   : > { %v429_v34 = vadd.f32 %v846_v21, %v390_v26  ;;  %v430_v35 = vadd.f32 %v846_v21, %v391_v27  ;;  %v394_v36 = vadd.f32 %v682_v19, %v362_v28  ;;  %v364_v37 = vmul.f32 %v622_v29, %v831_v0 }
  0x18   : > { %v431_v38 = vadd.f32 %v846_v21, %v392_v30  ;;  %v432_v39 = vadd.f32 %v846_v21, %v393_v31  ;;  %v395_v40 = vadd.f32 %v683_v25, %v363_v32  ;;  %v623_v41 = vunpack.c.h.bf16 %v738_v15  ;;  %v743_v32 = vld [vmem:[%s821_s21 + $0x40] sm:$0xff]  }
  0x19   : > { %v461_v43 = vmax.f32 %v429_v34, 0.0  ;;  %v462_v44 = vmax.f32 %v430_v35, 0.0  ;;  %v433_v45 = vadd.f32 %v846_v21, %v394_v36  ;;  %v396_v46 = vadd.f32 %v686_v33, %v364_v37  ;;  %v758_v37 = vld [vmem:[%s826_s24 + $0x40] sm:$0xff]  }
  0x1a   : > { %v463_v48 = vmax.f32 %v431_v38, 0.0  ;;  %v464_v49 = vmax.f32 %v432_v39, 0.0  ;;  %v434_v50 = vadd.f32 %v846_v21, %v395_v40  ;;  %v687_v51 = vunpack.c.h.bf16 %v753_v20 }
  0x1b   : > { %493 = vst [vmem:[%s859_s6] sm:$0xff] %v461_v43  ;;  %494 = vst [vmem:[%s859_s6 + $0x8] sm:$0xff] %v462_v44  ;;  %v465_v53 = vmax.f32 %v433_v45, 0.0  ;;  %v435_v54 = vadd.f32 %v846_v21, %v396_v46  ;;  %v365_v55 = vmul.f32 %v623_v41, %v831_v0  ;;  %v626_v56 = vunpack.c.l.bf16 %v739_v42  ;;  %v744_v46 = vld [vmem:[%s821_s21 + $0x48] sm:$0xff]  }
  0x1c   : > { %495 = vst [vmem:[%s859_s6 + $0x10] sm:$0xff] %v463_v48  ;;  %496 = vst [vmem:[%s859_s6 + $0x18] sm:$0xff] %v464_v49  ;;  %v466_v58 = vmax.f32 %v434_v50, 0.0  ;;  %v690_v59 = vunpack.c.l.bf16 %v754_v47  ;;  %v627_v60 = vunpack.c.h.bf16 %v739_v42  ;;  %v691_v61 = vunpack.c.h.bf16 %v754_v47  ;;  %v759_v47 = vld [vmem:[%s826_s24 + $0x48] sm:$0xff]  }
  0x1d   : > { %497 = vst [vmem:[%s859_s6 + $0x20] sm:$0xff] %v465_v53  ;;  %v467_v63 = vmax.f32 %v435_v54, 0.0  ;;  %v397_v1 = vadd.f32 %v687_v51, %v365_v55  ;;  %v366_v2 = vmul.f32 %v626_v56, %v831_v0  ;;  %v630_v3 = vunpack.c.l.bf16 %v740_v52  ;;  %v745_v56 = vld [vmem:[%s821_s21 + $0x50] sm:$0xff]  }
  0x1e   : > { %498 = vst [vmem:[%s859_s6 + $0x28] sm:$0xff] %v466_v58  ;;  %v367_v5 = vmul.f32 %v627_v60, %v831_v0  ;;  %v694_v6 = vunpack.c.l.bf16 %v755_v57  ;;  %v631_v7 = vunpack.c.h.bf16 %v740_v52  ;;  %v695_v8 = vunpack.c.h.bf16 %v755_v57 }
  0x1f   : > { %499 = vst [vmem:[%s859_s6 + $0x30] sm:$0xff] %v467_v63  ;;  %v436_v9 = vadd.f32 %v846_v21, %v397_v1  ;;  %v398_v10 = vadd.f32 %v690_v59, %v366_v2  ;;  %v368_v11 = vmul.f32 %v630_v3, %v831_v0  ;;  %v634_v12 = vunpack.c.l.bf16 %v741_v62 }
  0x20   : > { %v399_v13 = vadd.f32 %v691_v61, %v367_v5  ;;  %v369_v14 = vmul.f32 %v631_v7, %v831_v0  ;;  %v698_v15 = vunpack.c.l.bf16 %v756_v4  ;;  %v635_v16 = vunpack.c.h.bf16 %v741_v62  ;;  %v760_v61 = vld [vmem:[%s826_s24 + $0x50] sm:$0xff]  }
  0x21   : > { %v468_v18 = vmax.f32 %v436_v9, 0.0  ;;  %v437_v19 = vadd.f32 %v846_v21, %v398_v10  ;;  %v400_v20 = vadd.f32 %v694_v6, %v368_v11  ;;  %v370_v22 = vmul.f32 %v634_v12, %v831_v0  ;;  %v746_v11 = vld [vmem:[%s821_s21 + $0x58] sm:$0xff]  }
  0x22   : > { %v438_v24 = vadd.f32 %v846_v21, %v399_v13  ;;  %v401_v25 = vadd.f32 %v695_v8, %v369_v14  ;;  %v699_v26 = vunpack.c.h.bf16 %v756_v4  ;;  %v371_v27 = vmul.f32 %v635_v16, %v831_v0  ;;  %v761_v16 = vld [vmem:[%s826_s24 + $0x58] sm:$0xff]  }
  0x23   : > { %500 = vst [vmem:[%s859_s6 + $0x38] sm:$0xff] %v468_v18  ;;  %v469_v28 = vmax.f32 %v437_v19, 0.0  ;;  %v439_v29 = vadd.f32 %v846_v21, %v400_v20  ;;  %v402_v30 = vadd.f32 %v698_v15, %v370_v22  ;;  %v638_v31 = vunpack.c.l.bf16 %v742_v17 }
  0x24   : > { %v470_v33 = vmax.f32 %v438_v24, 0.0  ;;  %v440_v34 = vadd.f32 %v846_v21, %v401_v25  ;;  %v403_v35 = vadd.f32 %v699_v26, %v371_v27  ;;  %v702_v36 = vunpack.c.l.bf16 %v757_v23  ;;  %v747_v26 = vld [vmem:[%s821_s21 + $0x60] sm:$0xff]  }
  0x25   : > { %501 = vst [vmem:[%s859_s6 + $0x40] sm:$0xff] %v469_v28  ;;  %v471_v38 = vmax.f32 %v439_v29, 0.0  ;;  %v441_v39 = vadd.f32 %v846_v21, %v402_v30  ;;  %v372_v40 = vmul.f32 %v638_v31, %v831_v0  ;;  %v639_v41 = vunpack.c.h.bf16 %v742_v17  ;;  %v762_v31 = vld [vmem:[%s826_s24 + $0x60] sm:$0xff]  }
  0x26   : > { %502 = vst [vmem:[%s859_s6 + $0x48] sm:$0xff] %v470_v33  ;;  %v472_v42 = vmax.f32 %v440_v34, 0.0  ;;  %v442_v43 = vadd.f32 %v846_v21, %v403_v35  ;;  %v703_v44 = vunpack.c.h.bf16 %v757_v23  ;;  %v642_v45 = vunpack.c.l.bf16 %v743_v32 }
  0x27   : > { %503 = vst [vmem:[%s859_s6 + $0x50] sm:$0xff] %v471_v38  ;;  %v473_v48 = vmax.f32 %v441_v39, 0.0  ;;  %v404_v49 = vadd.f32 %v702_v36, %v372_v40  ;;  %v373_v50 = vmul.f32 %v639_v41, %v831_v0  ;;  %v706_v51 = vunpack.c.l.bf16 %v758_v37  ;;  %v748_v40 = vld [vmem:[%s821_s21 + $0x68] sm:$0xff]  }
  0x28   : > { %504 = vst [vmem:[%s859_s6 + $0x58] sm:$0xff] %v472_v42  ;;  %v474_v52 = vmax.f32 %v442_v43, 0.0  ;;  %v374_v53 = vmul.f32 %v642_v45, %v831_v0  ;;  %v643_v54 = vunpack.c.h.bf16 %v743_v32  ;;  %v707_v55 = vunpack.c.h.bf16 %v758_v37  ;;  %v763_v41 = vld [vmem:[%s826_s24 + $0x68] sm:$0xff]  }
  0x29   : > { %505 = vst [vmem:[%s859_s6 + $0x60] sm:$0xff] %v473_v48  ;;  %v443_v57 = vadd.f32 %v846_v21, %v404_v49  ;;  %v405_v58 = vadd.f32 %v703_v44, %v373_v50  ;;  %v646_v59 = vunpack.c.l.bf16 %v744_v46  ;;  %v710_v60 = vunpack.c.l.bf16 %v759_v47  ;;  %v749_v50 = vld [vmem:[%s821_s21 + $0x70] sm:$0xff]  }
  0x2a   : > { %506 = vst [vmem:[%s859_s6 + $0x68] sm:$0xff] %v474_v52  ;;  %v406_v62 = vadd.f32 %v706_v51, %v374_v53  ;;  %v375_v63 = vmul.f32 %v643_v54, %v831_v0  ;;  %v647_v1 = vunpack.c.h.bf16 %v744_v46  ;;  %v711_v2 = vunpack.c.h.bf16 %v759_v47 }
  0x2b   : > { %v475_v3 = vmax.f32 %v443_v57, 0.0  ;;  %v444_v4 = vadd.f32 %v846_v21, %v405_v58  ;;  %v376_v5 = vmul.f32 %v646_v59, %v831_v0  ;;  %v650_v6 = vunpack.c.l.bf16 %v745_v56  ;;  %v764_v59 = vld [vmem:[%s826_s24 + $0x70] sm:$0xff]  }
  0x2c   : > { %v445_v7 = vadd.f32 %v846_v21, %v406_v62  ;;  %v407_v8 = vadd.f32 %v707_v55, %v375_v63  ;;  %v377_v9 = vmul.f32 %v647_v1, %v831_v0  ;;  %v714_v10 = vunpack.c.l.bf16 %v760_v61 }
  0x2d   : > { %507 = vst [vmem:[%s859_s6 + $0x70] sm:$0xff] %v475_v3  ;;  %v476_v12 = vmax.f32 %v444_v4, 0.0  ;;  %v408_v13 = vadd.f32 %v710_v60, %v376_v5  ;;  %v378_v14 = vmul.f32 %v650_v6, %v831_v0  ;;  %v651_v15 = vunpack.c.h.bf16 %v745_v56  ;;  %v750_v5 = vld [vmem:[%s821_s21 + $0x78] sm:$0xff]  }
  0x2e   : > { %v477_v17 = vmax.f32 %v445_v7, 0.0  ;;  %v446_v18 = vadd.f32 %v846_v21, %v407_v8  ;;  %v409_v19 = vadd.f32 %v711_v2, %v377_v9  ;;  %v715_v20 = vunpack.c.h.bf16 %v760_v61 }
  0x2f   : > { %508 = vst [vmem:[%s859_s6 + $0x78] sm:$0xff] %v476_v12  ;;  %v447_v22 = vadd.f32 %v846_v21, %v408_v13  ;;  %v410_v23 = vadd.f32 %v714_v10, %v378_v14  ;;  %v379_v24 = vmul.f32 %v651_v15, %v831_v0  ;;  %v654_v25 = vunpack.c.l.bf16 %v746_v11  ;;  %v765_v10 = vld [vmem:[%s826_s24 + $0x78] sm:$0xff]  }
  0x30   : > { %509 = vst [vmem:[%s859_s6 + $0x80] sm:$0xff] %v477_v17  ;;  %v478_v27 = vmax.f32 %v446_v18, 0.0  ;;  %v448_v28 = vadd.f32 %v846_v21, %v409_v19  ;;  %v718_v29 = vunpack.c.l.bf16 %v761_v16  ;;  %v655_v30 = vunpack.c.h.bf16 %v746_v11 }
  0x31   : > { %v479_v32 = vmax.f32 %v447_v22, 0.0  ;;  %v449_v33 = vadd.f32 %v846_v21, %v410_v23  ;;  %v411_v34 = vadd.f32 %v715_v20, %v379_v24  ;;  %v380_v35 = vmul.f32 %v654_v25, %v831_v0 }
  0x32   : > { %510 = vst [vmem:[%s859_s6 + $0x88] sm:$0xff] %v478_v27  ;;  %v480_v36 = vmax.f32 %v448_v28, 0.0  ;;  %v719_v37 = vunpack.c.h.bf16 %v761_v16  ;;  %v381_v38 = vmul.f32 %v655_v30, %v831_v0  ;;  %v658_v39 = vunpack.c.l.bf16 %v747_v26 }
  0x33   : > { %511 = vst [vmem:[%s859_s6 + $0x90] sm:$0xff] %v479_v32  ;;  %v481_v42 = vmax.f32 %v449_v33, 0.0  ;;  %v450_v43 = vadd.f32 %v846_v21, %v411_v34  ;;  %v412_v44 = vadd.f32 %v718_v29, %v380_v35  ;;  %v722_v45 = vunpack.c.l.bf16 %v762_v31 }
  0x34   : > { %512 = vst [vmem:[%s859_s6 + $0x98] sm:$0xff] %v480_v36  ;;  %v413_v46 = vadd.f32 %v719_v37, %v381_v38  ;;  %v382_v47 = vmul.f32 %v658_v39, %v831_v0  ;;  %v659_v48 = vunpack.c.h.bf16 %v747_v26  ;;  %v723_v49 = vunpack.c.h.bf16 %v762_v31 }
  0x35   : > { %513 = vst [vmem:[%s859_s6 + $0xa0] sm:$0xff] %v481_v42  ;;  %v482_v51 = vmax.f32 %v450_v43, 0.0  ;;  %v451_v52 = vadd.f32 %v846_v21, %v412_v44  ;;  %v662_v53 = vunpack.c.l.bf16 %v748_v40  ;;  %v726_v54 = vunpack.c.l.bf16 %v763_v41 }
  0x36   : > { %v452_v55 = vadd.f32 %v846_v21, %v413_v46  ;;  %v414_v56 = vadd.f32 %v722_v45, %v382_v47  ;;  %v383_v57 = vmul.f32 %v659_v48, %v831_v0  ;;  %v663_v58 = vunpack.c.h.bf16 %v748_v40 }
  0x37   : > { %514 = vst [vmem:[%s859_s6 + $0xa8] sm:$0xff] %v482_v51  ;;  %v483_v60 = vmax.f32 %v451_v52, 0.0  ;;  %v384_v61 = vmul.f32 %v662_v53, %v831_v0  ;;  %v727_v62 = vunpack.c.h.bf16 %v763_v41  ;;  %v666_v63 = vunpack.c.l.bf16 %v749_v50 }
  0x38   : > { %v484_v1 = vmax.f32 %v452_v55, 0.0  ;;  %v453_v2 = vadd.f32 %v846_v21, %v414_v56  ;;  %v415_v3 = vadd.f32 %v723_v49, %v383_v57  ;;  %v385_v4 = vmul.f32 %v663_v58, %v831_v0 }
  0x39   : > { %515 = vst [vmem:[%s859_s6 + $0xb0] sm:$0xff] %v483_v60  ;;  %v416_v6 = vadd.f32 %v726_v54, %v384_v61  ;;  %v730_v7 = vunpack.c.l.bf16 %v764_v59  ;;  %v386_v8 = vmul.f32 %v666_v63, %v831_v0  ;;  %v667_v9 = vunpack.c.h.bf16 %v749_v50 }
  0x3a   : > { %516 = vst [vmem:[%s859_s6 + $0xb8] sm:$0xff] %v484_v1  ;;  %v485_v11 = vmax.f32 %v453_v2, 0.0  ;;  %v454_v12 = vadd.f32 %v846_v21, %v415_v3  ;;  %v417_v13 = vadd.f32 %v727_v62, %v385_v4  ;;  %v731_v14 = vunpack.c.h.bf16 %v764_v59 }
  0x3b   : > { %v455_v15 = vadd.f32 %v846_v21, %v416_v6  ;;  %v418_v16 = vadd.f32 %v730_v7, %v386_v8  ;;  %v387_v17 = vmul.f32 %v667_v9, %v831_v0  ;;  %v670_v18 = vunpack.c.l.bf16 %v750_v5 }
  0x3c   : > { %517 = vst [vmem:[%s859_s6 + $0xc0] sm:$0xff] %v485_v11  ;;  %v486_v19 = vmax.f32 %v454_v12, 0.0  ;;  %v456_v20 = vadd.f32 %v846_v21, %v417_v13  ;;  %v734_v22 = vunpack.c.l.bf16 %v765_v10  ;;  %v671_v23 = vunpack.c.h.bf16 %v750_v5 }
  0x3d   : > { %v487_v24 = vmax.f32 %v455_v15, 0.0  ;;  %v457_v25 = vadd.f32 %v846_v21, %v418_v16  ;;  %v419_v26 = vadd.f32 %v731_v14, %v387_v17  ;;  %v388_v27 = vmul.f32 %v670_v18, %v831_v0 }
  0x3e   : > { %518 = vst [vmem:[%s859_s6 + $0xc8] sm:$0xff] %v486_v19  ;;  %v488_v28 = vmax.f32 %v456_v20, 0.0  ;;  %v735_v29 = vunpack.c.h.bf16 %v765_v10  ;;  %v389_v30 = vmul.f32 %v671_v23, %v831_v0 }
  0x3f   : > { %519 = vst [vmem:[%s859_s6 + $0xd0] sm:$0xff] %v487_v24  ;;  %v489_v31 = vmax.f32 %v457_v25, 0.0  ;;  %v458_v32 = vadd.f32 %v846_v21, %v419_v26  ;;  %v420_v33 = vadd.f32 %v734_v22, %v388_v27 }
  0x40   : > { %520 = vst [vmem:[%s859_s6 + $0xd8] sm:$0xff] %v488_v28  ;;  %v421_v34 = vadd.f32 %v735_v29, %v389_v30 }
  0x41   : > { %521 = vst [vmem:[%s859_s6 + $0xe0] sm:$0xff] %v489_v31  ;;  %v490_v35 = vmax.f32 %v458_v32, 0.0  ;;  %v459_v36 = vadd.f32 %v846_v21, %v420_v33 }
  0x42   : > { %v460_v37 = vadd.f32 %v846_v21, %v421_v34 }
  0x43   : > { %522 = vst [vmem:[%s859_s6 + $0xe8] sm:$0xff] %v490_v35  ;;  %v491_v38 = vmax.f32 %v459_v36, 0.0 }
  0x44   : > { %v492_v39 = vmax.f32 %v460_v37, 0.0 }
  0x45   : > { %523 = vst [vmem:[%s859_s6 + $0xf0] sm:$0xff] %v491_v38 }
  0x46   : > { %524 = vst [vmem:[%s859_s6 + $0xf8] sm:$0xff] %v492_v39 }
  0x47 PF: > { %s14_s15 = sadd.s32 1, %s780_s15  }
  0x48   : > { %p11_p4 = scmp.ge.s32.totalorder %s14_s15, 4  }
  0x4a   :  { %13 = sbr.rel (!%p11_p4) target bundleno = 1 (0x1), region = 69 }

</bundles_post_ra>
